<compile_context>
chip_gen: v6e
topology: v6e:2x2x1
jax: 0.10.0
libtpu: 0.0.40
codegen_flags: <defaults>
</compile_context>

<pallas_src>
import jax
import jax.numpy as jnp
from jax.experimental import pallas as pl
from jax.experimental.pallas import tpu as pltpu

LANE = 128                    # vreg lane width (minimum unmasked store width)
MAX_LANE_WIDTH = 1024         # widest lane-dense slab we try for the copy
TARGET_BLOCK_BYTES = 2 << 20  # ~2 MiB per copy block (~85%+ of HBM roofline)


# ----------------------------------------------------------------------------
# Faithful ReNet translation: forward() -> None
# ----------------------------------------------------------------------------
def renet_forward():
    """Exact semantics of the PyTorch ReNet.forward(): no args, returns None."""
    return None


# ----------------------------------------------------------------------------
# Demo kernel 1: lane-dense, aliased identity copy (mem-bound path).
# ----------------------------------------------------------------------------
def _identity_kernel(x_ref, o_ref):
    # Whole-tile pass-through; fully unmasked vld/vst (lane width >= 128).
    o_ref[...] = x_ref[...]


def _choose_lane_width(total: int) -> int:
    """Widest power-of-two multiple of 128 (<= MAX_LANE_WIDTH) dividing total."""
    w = MAX_LANE_WIDTH
    while w > LANE and total % w != 0:
        w //= 2
    assert total % w == 0, "flattened size must be a multiple of 128"
    return w


def _choose_tile_rows(rows: int, width: int, itemsize: int) -> int:
    """Largest row tile that divides `rows`, is a multiple of 8 (sublane
    tiling), and keeps one block near TARGET_BLOCK_BYTES."""
    if rows <= 8:
        return rows
    cap = max(8, TARGET_BLOCK_BYTES // (width * itemsize))
    tile = min(rows, cap)
    tile -= tile % 8
    while tile >= 8 and rows % tile != 0:
        tile -= 8
    return tile if tile >= 8 else rows


def identity_pallas(x_nchw: jax.Array) -> jax.Array:
    """Identity over an NCHW tensor, computed inside a Pallas TPU kernel.

    The tensor is flattened to a lane-dense [rows, width] slab (width = widest
    multiple of 128 that divides it), tiled along rows at ~2 MiB per block,
    and the output aliases the input buffer (no second HBM allocation).
    """
    orig_shape = x_nchw.shape
    total = x_nchw.size
    assert total % LANE == 0, "demo tensor must flatten to a multiple of 128"

    width = _choose_lane_width(total)
    rows = total // width
    x2d = x_nchw.reshape(rows, width)  # contiguous reshape: bitcast, no copy

    itemsize = jnp.dtype(x2d.dtype).itemsize
    tile_rows = _choose_tile_rows(rows, width, itemsize)
    grid = (rows // tile_rows,)

    out2d = pl.pallas_call(
        _identity_kernel,
        out_shape=jax.ShapeDtypeStruct((rows, width), x2d.dtype),
        grid=grid,
        in_specs=[pl.BlockSpec((tile_rows, width), lambda i: (i, 0))],
        out_specs=pl.BlockSpec((tile_rows, width), lambda i: (i, 0)),
        input_output_aliases={0: 0},  # write back into the input buffer
        compiler_params=pltpu.CompilerParams(
            dimension_semantics=("parallel",)
        ),
        cost_estimate=pl.CostEstimate(
            flops=0,
            transcendentals=0,
            bytes_accessed=2 * total * itemsize,
        ),
    )(x2d)

    return out2d.reshape(orig_shape)


# Donate the input so the pallas-level aliasing is realized end-to-end.
identity_pallas_jit = jax.jit(identity_pallas, donate_argnums=(0,))


# ----------------------------------------------------------------------------
# Demo kernel 2a: single-block MXU matmul (whole operands in VMEM, no grid).
# ----------------------------------------------------------------------------
def _matmul_kernel(a_ref, b_ref, o_ref):
    o_ref[...] = jnp.dot(
        a_ref[...], b_ref[...], preferred_element_type=jnp.float32
    )


def matmul_pallas_single(a: jax.Array, b: jax.Array) -> jax.Array:
    """(M,K)x(K,N) matmul on the MXU, f32 accumulation, whole-array blocks.

    No grid / BlockSpecs: operands are small enough to live in VMEM as one
    block, so we skip the per-step pipeline setup entirely.
    """
    m, k = a.shape
    k2, n = b.shape
    assert k == k2
    itemsize = jnp.dtype(a.dtype).itemsize
    return pl.pallas_call(
        _matmul_kernel,
        out_shape=jax.ShapeDtypeStruct((m, n), jnp.float32),
        cost_estimate=pl.CostEstimate(
            flops=2 * m * n * k,
            transcendentals=0,
            bytes_accessed=(m * k + k * n) * itemsize + m * n * 4,
        ),
    )(a, b)


# ----------------------------------------------------------------------------
# Demo kernel 2b: tiled (i, j, k) matmul with f32 VMEM accumulator.
# ----------------------------------------------------------------------------
def _matmul_tiled_kernel(a_ref, b_ref, o_ref, acc_ref):
    @pl.when(pl.program_id(2) == 0)
    def _():
        acc_ref[...] = jnp.zeros_like(acc_ref)

    acc_ref[...] += jnp.dot(
        a_ref[...], b_ref[...], preferred_element_type=jnp.float32
    )

    @pl.when(pl.program_id(2) == pl.num_programs(2) - 1)
    def _():
        o_ref[...] = acc_ref[...].astype(o_ref.dtype)


def matmul_pallas_tiled(a: jax.Array, b: jax.Array, *,
                        tm: int = 256, tn: int = 256, tk: int = 256) -> jax.Array:
    """Standard (i, j, k) tiling: parallel M/N axes, K reduction last with a
    VMEM f32 accumulator — the scale-up path when one VMEM tile is not enough."""
    m, k = a.shape
    k2, n = b.shape
    assert k == k2
    tm, tn, tk = min(tm, m), min(tn, n), min(tk, k)
    assert m % tm == 0 and n % tn == 0 and k % tk == 0
    itemsize = jnp.dtype(a.dtype).itemsize
    return pl.pallas_call(
        _matmul_tiled_kernel,
        out_shape=jax.ShapeDtypeStruct((m, n), jnp.float32),
        grid_spec=pltpu.PrefetchScalarGridSpec(
            num_scalar_prefetch=0,
            grid=(m // tm, n // tn, k // tk),
            in_specs=[
                pl.BlockSpec((tm, tk), lambda i, j, kk: (i, kk)),
                pl.BlockSpec((tk, tn), lambda i, j, kk: (kk, j)),
            ],
            out_specs=pl.BlockSpec((tm, tn), lambda i, j, kk: (i, j)),
            scratch_shapes=[pltpu.VMEM((tm, tn), jnp.float32)],
        ),
        compiler_params=pltpu.CompilerParams(
            dimension_semantics=("parallel", "parallel", "arbitrary")
        ),
        cost_estimate=pl.CostEstimate(
            flops=2 * m * n * k,
            transcendentals=0,
            bytes_accessed=(m * k + k * n) * itemsize + m * n * 4,
        ),
    )(a, b)


if __name__ == "__main__":
    key = jax.random.PRNGKey(0)
    k_x, k_big, k_a, k_b, k_a2, k_b2 = jax.random.split(key, 6)

    # 1) Faithful ReNet forward: returns None (matches PyTorch semantics).
    assert renet_forward() is None

    # 2) Module-consistent tiny identity (2,4,16,16) -> lane width 1024.
    x = jax.random.normal(k_x, (2, 4, 16, 16), dtype=jnp.float32)
    x_host = jax.device_get(x)  # keep a host copy; x is donated below
    y = identity_pallas_jit(x)
    jax.block_until_ready(y)
    assert y.shape == (2, 4, 16, 16) and y.dtype == jnp.float32
    assert bool(jnp.allclose(y, jnp.asarray(x_host)))

    # 3) Bandwidth-path identity: 4 MiB, lane width 1024, 2 MiB blocks,
    #    grid=(2,) so the ("parallel",) annotation can split across cores.
    xb = jax.random.normal(k_big, (4, 16, 128, 128), dtype=jnp.float32)
    xb_host = jax.device_get(xb)
    yb = identity_pallas_jit(xb)
    jax.block_until_ready(yb)
    assert yb.shape == (4, 16, 128, 128)
    assert bool(jnp.allclose(yb, jnp.asarray(xb_host)))

    # 4) Single-block MXU matmul: 256^3 bf16 fills the 256x256 MXU (v6e/v7x).
    a = jax.random.normal(k_a, (256, 256), dtype=jnp.bfloat16)
    b = jax.random.normal(k_b, (256, 256), dtype=jnp.bfloat16)
    c = matmul_pallas_single(a, b)
    jax.block_until_ready(c)
    c_ref = jnp.dot(a, b, preferred_element_type=jnp.float32)
    assert bool(jnp.allclose(c, c_ref, rtol=1e-2, atol=1e-2))

    # 5) Tiled matmul scale-up path: 512^3 bf16, grid (2,2,2), f32 accumulator.
    a2 = jax.random.normal(k_a2, (512, 512), dtype=jnp.bfloat16)
    b2 = jax.random.normal(k_b2, (512, 512), dtype=jnp.bfloat16)
    c2 = matmul_pallas_tiled(a2, b2)
    jax.block_until_ready(c2)
    c2_ref = jnp.dot(a2, b2, preferred_element_type=jnp.float32)
    assert bool(jnp.allclose(c2, c2_ref, rtol=1e-2, atol=1e-2))

    print("KERNEL_OK")
</pallas_src>

<mosaic_0001>
module attributes {stable_mosaic.version = 11 : i64} {
  func.func @_identity_kernel(%arg0: i32, %arg1: memref<2x1024xf32, #tpu.memory_space<vmem>>, %arg2: memref<2x1024xf32, #tpu.memory_space<vmem>>) attributes {dimension_semantics = [#tpu.dimension_semantics<parallel>], iteration_bounds = array<i64: 1>, scalar_prefetch = 0 : i64, scratch_operands = 0 : i64, tpu.core_type = #tpu.core_type<tc>, window_params = [{transform_indices = @transform_0, window_bounds = array<i64: 2, 1024>}, {transform_indices = @transform_1, window_bounds = array<i64: 2, 1024>}]} {
    %c0 = arith.constant 0 : index
    %c0_0 = arith.constant 0 : index
    %0 = vector.load %arg1[%c0, %c0_0] : memref<2x1024xf32, #tpu.memory_space<vmem>>, vector<2x1024xf32>
    %c0_1 = arith.constant 0 : index
    %c0_2 = arith.constant 0 : index
    %1 = vector.load %arg2[%c0_1, %c0_2] : memref<2x1024xf32, #tpu.memory_space<vmem>>, vector<2x1024xf32>
    tpu.vector_store %arg2[%c0_1, %c0_2], %0 {strides = array<i32>} : memref<2x1024xf32, #tpu.memory_space<vmem>>, vector<2x1024xf32>,
    return
  }
  func.func @transform_0(%arg0: i32) -> (i32, i32) {
    %c0_i32 = arith.constant 0 : i32
    %c0_i32_0 = arith.constant 0 : i32
    return %arg0, %c0_i32 : i32, i32
  }
  func.func @transform_1(%arg0: i32) -> (i32, i32) {
    %c0_i32 = arith.constant 0 : i32
    %c0_i32_0 = arith.constant 0 : i32
    return %arg0, %c0_i32 : i32, i32
  }
}

</mosaic_0001>

<bundles_post_ra>
// kernel: identity_pallas.1
= control target key start
LH: loop header
LB: loop body
LE: loop exit
PB: predicated region body
PF: predicated region fallthrough
CT: control target
= control target key end

     0   :  { %s38_s0 = inlined_call_operand.vmem [shape: f32[2,1024], index: 0, kind: input, shape index: {}, may-alias: {0,1}]   ;;  %s39_s1 = inlined_call_operand.vmem [shape: f32[2,1024], index: 1, kind: output, shape index: {}, may-alias: {0,1}]  }
   0x1   :  { %v8_v0 = vld [vmem:[%s38_s0] sm:$0xff]  ;;  %v9_v1 = vld [vmem:[%s38_s0 + $0x8] sm:$0xff] }
   0x2   :  { %10 = vst [vmem:[%s39_s1] sm:$0xff] %v8_v0  ;;  %11 = vst [vmem:[%s39_s1 + $0x8] sm:$0xff] %v9_v1 }

</bundles_post_ra>
